<compile_context>
chip_gen: v5e
topology: v5e:2x2
jax: 0.10.0
libtpu: 0.0.40
codegen_flags: <defaults>
</compile_context>

<pallas_src>
import functools

import jax
import jax.numpy as jnp
from jax import lax
from jax.experimental import pallas as pl
from jax.experimental.pallas import tpu as pltpu


_BLOCK_ELEMS = 2 * 1024 * 1024          # logits elements per block (~8 MiB f32-equiv)
_VMEM_LIMIT_BYTES = 48 * 1024 * 1024    # safe on v5e/v6e (128 MiB) and v7x (64 MiB)
_NEG_BIG = -1.0e30                      # finite "minus infinity" (avoids inf-inf NaNs)


def _round_down(x, m):
    return (x // m) * m


def _round_up(x, m):
    return ((x + m - 1) // m) * m


def _fit_token_tile(requested, n_tokens):
    """Clamp a token tile to a legal value (multiple of 8, or the full dim for
    tiny inputs) and keep >= 4 token blocks when possible so the v7x megacore
    'parallel' axis is well balanced across both TensorCores."""
    if n_tokens <= 8:
        return max(n_tokens, 1)
    tt = min(requested, n_tokens)
    if n_tokens >= 32:
        tt = min(tt, n_tokens // 4)
    return max(8, _round_down(tt, 8))


def _choose_tiles(n_tokens, vocab):
    """Pick (token_tile, vocab_tile). vocab_tile == vocab selects the simple
    single-vocab-block kernel; otherwise the vocab-tiled online-LSE kernel."""
    tt_full = _BLOCK_ELEMS // max(vocab, 1)
    if tt_full >= 8:
        # Moderate vocab: full-vocab rows, one vocab block per token block.
        return _fit_token_tile(tt_full, n_tokens), vocab
    # Huge vocab: tile the vocab axis (online logsumexp), ~_BLOCK_ELEMS per block.
    tt = _fit_token_tile(256, n_tokens)
    tv = _round_down(max(_BLOCK_ELEMS // tt, 128), 128)
    tv = min(tv, _round_up(vocab, 128))
    return tt, tv


# ---------------------------------------------------------------------------
# Kernels
# ---------------------------------------------------------------------------


def _ce_single_block_kernel(logits_ref, ids_ref, loss_ref):
    """Per-token cross-entropy; the whole vocab fits one block.

    No online-LSE scratch / alpha rescale / pl.when bookkeeping. Each consumer
    streams directly from the input VMEM buffer (separate `logits_ref[...]`
    reads) so no block-sized f32 copy is kept live. Padded token-tail rows of
    the last block only produce garbage in their own (dropped) output rows,
    since every reduction here is per-row (keepdims).
    """
    tt, v = logits_ref.shape
    ids = ids_ref[...]                                                # (TT, 1) i32

    # Row max in the native dtype (exact for max); upcast only the (TT,1) result.
    m = jnp.max(logits_ref[...], axis=-1, keepdims=True).astype(jnp.float32)
    se = jnp.sum(jnp.exp(logits_ref[...].astype(jnp.float32) - m),
                 axis=-1, keepdims=True)                              # (TT, 1) f32

    # Gold logit via one-hot compare (no gather). Block dim == full vocab, so
    # there is no padded-column garbage to mask on this path.
    col = lax.broadcasted_iota(jnp.int32, (tt, v), 1)
    gold = jnp.sum(jnp.where(col == ids, logits_ref[...],
                             jnp.zeros((), logits_ref.dtype)),
                   axis=-1, keepdims=True).astype(jnp.float32)

    loss_ref[...] = m + jnp.log(se) - gold


def _ce_online_lse_kernel(logits_ref, ids_ref, loss_ref, m_ref, l_ref, g_ref,
                          *, vocab_size):
    """Per-token cross-entropy with a vocab-tiled online logsumexp.

    Grid: (token_blocks [parallel], vocab_blocks [arbitrary / reduction]).

    logits_ref : (TT, TV) float   VMEM tile of logits (native dtype)
    ids_ref    : (TT, 1)  int32   labels (resident across the vocab axis)
    loss_ref   : (TT, 1)  f32     per-token loss (written on the last vocab step)
    m_ref/l_ref/g_ref : (TT, 1) f32 running max / sum-exp / gold accumulators.
    """
    k = pl.program_id(1)
    nk = pl.num_programs(1)
    tt, tv = logits_ref.shape
    v_rem = vocab_size % tv               # trace-time ragged-vocab tail size

    @pl.when(k == 0)
    def _init():
        m_ref[...] = jnp.full(m_ref.shape, _NEG_BIG, dtype=m_ref.dtype)
        l_ref[...] = jnp.zeros_like(l_ref)
        g_ref[...] = jnp.zeros_like(g_ref)

    ids = ids_ref[...]                                                # (TT, 1) i32

    def col():
        # Rebuilt inline at each use so the iota fuses into that consumer's
        # chain instead of materializing a (TT, TV) int32 temp in VMEM.
        return k * tv + lax.broadcasted_iota(jnp.int32, (tt, tv), 1)

    def update(tail):
        def load():
            x = logits_ref[...]                                       # native dtype
            if tail:
                x = jnp.where(col() < vocab_size, x,
                              jnp.asarray(_NEG_BIG, dtype=x.dtype))
            return x

        m_prev = m_ref[...]
        # Row max of this tile in the native dtype (exact), upcast the (TT,1).
        m_step = jnp.max(load(), axis=-1, keepdims=True).astype(jnp.float32)
        m_new = jnp.maximum(m_prev, m_step)
        p_sum = jnp.sum(jnp.exp(load().astype(jnp.float32) - m_new),
                        axis=-1, keepdims=True)
        l_ref[...] = jnp.exp(m_prev - m_new) * l_ref[...] + p_sum
        m_ref[...] = m_new
        # Gold logit via one-hot compare; ids < vocab_size, so the tail mask
        # can never hide the gold column.
        g_ref[...] = g_ref[...] + jnp.sum(
            jnp.where(col() == ids, load(), jnp.zeros((), logits_ref.dtype)),
            axis=-1, keepdims=True).astype(jnp.float32)

    if v_rem == 0:
        # Vocab divides the tile evenly: no tail mask at all (trace time).
        update(tail=False)
    else:
        # The tail mask only executes at runtime on the final vocab step; the
        # steady-state steps carry no iota/compare/select masking cost.
        @pl.when(k < nk - 1)
        def _steady():
            update(tail=False)

        @pl.when(k == nk - 1)
        def _last():
            update(tail=True)

    @pl.when(k == nk - 1)
    def _finalize():
        loss_ref[...] = m_ref[...] + jnp.log(l_ref[...]) - g_ref[...]


# ---------------------------------------------------------------------------
# pallas_call wrappers
# ---------------------------------------------------------------------------


def _ce_pallas(logits2d, ids2d, token_tile, vocab_tile):
    """Flattened (N, V) logits + (N, 1) int32 ids -> (N, 1) f32 per-token CE."""
    n_tokens, vocab = logits2d.shape
    tt = _fit_token_tile(token_tile, n_tokens)

    tv = vocab_tile
    if tv < vocab:
        tv = max(128, _round_up(tv, 128))

    if tv >= vocab:
        # --- single vocab block: simple kernel, no scratch ------------------
        grid = (pl.cdiv(n_tokens, tt),)
        return pl.pallas_call(
            _ce_single_block_kernel,
            out_shape=jax.ShapeDtypeStruct((n_tokens, 1), jnp.float32),
            grid_spec=pltpu.PrefetchScalarGridSpec(
                num_scalar_prefetch=0,
                grid=grid,
                in_specs=[
                    pl.BlockSpec((tt, vocab), lambda i: (i, 0)),
                    pl.BlockSpec((tt, 1), lambda i: (i, 0)),
                ],
                out_specs=pl.BlockSpec((tt, 1), lambda i: (i, 0)),
            ),
            compiler_params=pltpu.CompilerParams(
                dimension_semantics=("parallel",),
                vmem_limit_bytes=_VMEM_LIMIT_BYTES,
            ),
        )(logits2d, ids2d)

    # --- vocab-tiled online logsumexp ---------------------------------------
    grid = (pl.cdiv(n_tokens, tt), pl.cdiv(vocab, tv))
    kernel = functools.partial(_ce_online_lse_kernel, vocab_size=vocab)
    return pl.pallas_call(
        kernel,
        out_shape=jax.ShapeDtypeStruct((n_tokens, 1), jnp.float32),
        grid_spec=pltpu.PrefetchScalarGridSpec(
            num_scalar_prefetch=0,
            grid=grid,
            in_specs=[
                pl.BlockSpec((tt, tv), lambda i, k: (i, k)),
                pl.BlockSpec((tt, 1), lambda i, k: (i, 0)),
            ],
            out_specs=pl.BlockSpec((tt, 1), lambda i, k: (i, 0)),
            scratch_shapes=[
                pltpu.VMEM((tt, 1), jnp.float32),   # running max
                pltpu.VMEM((tt, 1), jnp.float32),   # running sum-exp
                pltpu.VMEM((tt, 1), jnp.float32),   # gold-logit accumulator
            ],
        ),
        compiler_params=pltpu.CompilerParams(
            dimension_semantics=("parallel", "arbitrary"),
            vmem_limit_bytes=_VMEM_LIMIT_BYTES,
        ),
    )(logits2d, ids2d)


@functools.partial(jax.jit,
                   static_argnames=("reduction", "token_tile", "vocab_tile"))
def loss_forward(logits, input_ids, attention_mask, z_t, t,
                 reduction="tokenmean", token_tile=None, vocab_tile=None):
    """JAX/Pallas equivalent of Loss.forward.

    logits:         (B, S, V) float (f32 or bf16; read in its native dtype)
    input_ids:      (B, S)    int
    attention_mask: (B, S)    (only numel() is used by the base forward)
    z_t, t:         passed through to the (abstract) loss; unused here.

    Returns (loss, elbo, metrics) like the PyTorch module.
    """
    B, S, V = logits.shape
    N = B * S
    logits2d = logits.reshape(N, V)                     # no dtype cast in wrapper
    ids2d = input_ids.reshape(N, 1).astype(jnp.int32)

    auto_tt, auto_tv = _choose_tiles(N, V)
    tt = auto_tt if token_tile is None else token_tile
    tv = auto_tv if vocab_tile is None else vocab_tile

    per_tok = _ce_pallas(logits2d, ids2d, tt, tv)       # (N, 1) f32

    elbo = per_tok.reshape(B, S)                        # per-token loss ("elbo")
    metrics = {}

    if reduction == "tokenmean":
        # Matches the PyTorch base class exactly: the attention mask is NOT
        # applied to the per-token losses; only its numel() is the denominator.
        num_tokens = attention_mask.size
        loss = per_tok.sum(dtype=jnp.float32) / num_tokens
    else:
        loss = elbo                                     # matches the `else: pass` path

    return loss, elbo, metrics


# ---------------------------------------------------------------------------
# Self-test
# ---------------------------------------------------------------------------


def _reference(logits, input_ids, attention_mask):
    """Pure-JAX reference for correctness checking."""
    logits = logits.astype(jnp.float32)
    lse = jax.nn.logsumexp(logits, axis=-1)
    gold = jnp.take_along_axis(logits, input_ids[..., None], axis=-1)[..., 0]
    per_tok = lse - gold
    return per_tok.sum() / attention_mask.size, per_tok


if __name__ == "__main__":
    key = jax.random.PRNGKey(0)
    k1, k2, k3, k4 = jax.random.split(key, 4)

    # Small shapes; V deliberately not a multiple of 128 (full-dim block path).
    B, S, V = 2, 128, 1000

    logits = jax.random.normal(k1, (B, S, V), dtype=jnp.float32)
    input_ids = jax.random.randint(k2, (B, S), 0, V, dtype=jnp.int32)
    attention_mask = jnp.ones((B, S), dtype=jnp.float32)
    z_t = jax.random.randint(k3, (B, S), 0, V, dtype=jnp.int32)   # noised tokens
    t = jax.random.uniform(k4, (B,), dtype=jnp.float32)           # diffusion time

    loss, elbo, metrics = loss_forward(logits, input_ids, attention_mask, z_t, t)
    loss = jax.block_until_ready(loss)
    elbo = jax.block_until_ready(elbo)

    ref_loss, ref_per_tok = _reference(logits, input_ids, attention_mask)
    assert jnp.allclose(loss, ref_loss, atol=1e-4, rtol=1e-4), (loss, ref_loss)
    assert jnp.allclose(elbo, ref_per_tok, atol=1e-4, rtol=1e-4)

    # bf16 logits exercise the native-dtype read / in-kernel upcast path.
    logits_bf16 = logits.astype(jnp.bfloat16)
    loss_b, elbo_b, _ = loss_forward(logits_bf16, input_ids, attention_mask, z_t, t)
    loss_b = jax.block_until_ready(loss_b)
    ref_loss_b, ref_per_tok_b = _reference(logits_bf16, input_ids, attention_mask)
    assert jnp.allclose(loss_b, ref_loss_b, atol=1e-3, rtol=1e-3)
    assert jnp.allclose(elbo_b, ref_per_tok_b, atol=1e-3, rtol=1e-3)

    # Also exercise the vocab-tiled online-LSE path (ragged token + ragged vocab
    # tails), as used for very large vocabularies.
    N2 = 2 * S - 3
    per_tok2 = _ce_pallas(
        logits.reshape(-1, V)[:N2],
        input_ids.reshape(-1, 1)[:N2].astype(jnp.int32),
        64, 256,
    )
    per_tok2 = jax.block_until_ready(per_tok2)
    assert jnp.allclose(per_tok2[:, 0], ref_per_tok.reshape(-1)[:N2],
                        atol=1e-4, rtol=1e-4)

    print("KERNEL_OK")
</pallas_src>

<mosaic_0001>
module attributes {stable_mosaic.version = 11 : i64} {
  func.func @_ce_single_block_kernel(%arg0: i32, %arg1: memref<64x1000xf32, #tpu.memory_space<vmem>>, %arg2: memref<64x1xi32, #tpu.memory_space<vmem>>, %arg3: memref<64x1xf32, #tpu.memory_space<vmem>>) attributes {dimension_semantics = [#tpu.dimension_semantics<parallel>], iteration_bounds = array<i64: 4>, scalar_prefetch = 0 : i64, scratch_operands = 0 : i64, tpu.core_type = #tpu.core_type<tc>, window_params = [{transform_indices = @transform_0, window_bounds = array<i64: 64, 1000>}, {transform_indices = @transform_1, window_bounds = array<i64: 64, 1>}, {transform_indices = @transform_2, window_bounds = array<i64: 64, 1>}]} {
    %c0 = arith.constant 0 : index
    %c0_0 = arith.constant 0 : index
    %0 = vector.load %arg2[%c0, %c0_0] : memref<64x1xi32, #tpu.memory_space<vmem>>, vector<64x1xi32>
    %c0_1 = arith.constant 0 : index
    %c0_2 = arith.constant 0 : index
    %1 = vector.load %arg1[%c0_1, %c0_2] : memref<64x1000xf32, #tpu.memory_space<vmem>>, vector<64x1000xf32>
    %cst = arith.constant dense<0xFF800000> : vector<64xf32>
    %2 = vector.multi_reduction <maximumf>, %1, %cst [1] : vector<64x1000xf32> to vector<64xf32>
    %3 = vector.shape_cast %2 : vector<64xf32> to vector<64x1xf32>
    %c0_3 = arith.constant 0 : index
    %c0_4 = arith.constant 0 : index
    %4 = vector.load %arg1[%c0_3, %c0_4] : memref<64x1000xf32, #tpu.memory_space<vmem>>, vector<64x1000xf32>
    %5 = vector.broadcast %3 : vector<64x1xf32> to vector<64x1000xf32>
    %6 = arith.subf %4, %5 : vector<64x1000xf32>
    %7 = math.exp %6 : vector<64x1000xf32>
    %cst_5 = arith.constant dense<0.000000e+00> : vector<64xf32>
    %8 = vector.multi_reduction <add>, %7, %cst_5 [1] : vector<64x1000xf32> to vector<64xf32>
    %9 = vector.shape_cast %8 : vector<64xf32> to vector<64x1xf32>
    %10 = tpu.iota {dimensions = array<i32: 1>} : vector<64x1000xi32>
    %11 = vector.broadcast %0 : vector<64x1xi32> to vector<64x1000xi32>
    %12 = arith.cmpi eq, %10, %11 : vector<64x1000xi32>
    %c0_6 = arith.constant 0 : index
    %c0_7 = arith.constant 0 : index
    %13 = vector.load %arg1[%c0_6, %c0_7] : memref<64x1000xf32, #tpu.memory_space<vmem>>, vector<64x1000xf32>
    %cst_8 = arith.constant 0.000000e+00 : f32
    %14 = vector.broadcast %cst_8 : f32 to vector<64x1000xf32>
    %15 = arith.select %12, %13, %14 : vector<64x1000xi1>, vector<64x1000xf32>
    %cst_9 = arith.constant dense<0.000000e+00> : vector<64xf32>
    %16 = vector.multi_reduction <add>, %15, %cst_9 [1] : vector<64x1000xf32> to vector<64xf32>
    %17 = vector.shape_cast %16 : vector<64xf32> to vector<64x1xf32>
    %18 = math.log %9 : vector<64x1xf32>
    %19 = arith.addf %3, %18 : vector<64x1xf32>
    %20 = arith.subf %19, %17 : vector<64x1xf32>
    %c0_10 = arith.constant 0 : index
    %c0_11 = arith.constant 0 : index
    %21 = vector.load %arg3[%c0_10, %c0_11] : memref<64x1xf32, #tpu.memory_space<vmem>>, vector<64x1xf32>
    tpu.vector_store %arg3[%c0_10, %c0_11], %20 {strides = array<i32>} : memref<64x1xf32, #tpu.memory_space<vmem>>, vector<64x1xf32>,
    return
  }
  func.func @transform_0(%arg0: i32) -> (i32, i32) {
    %c0_i32 = arith.constant 0 : i32
    %c0_i32_0 = arith.constant 0 : i32
    return %arg0, %c0_i32 : i32, i32
  }
  func.func @transform_1(%arg0: i32) -> (i32, i32) {
    %c0_i32 = arith.constant 0 : i32
    %c0_i32_0 = arith.constant 0 : i32
    return %arg0, %c0_i32 : i32, i32
  }
  func.func @transform_2(%arg0: i32) -> (i32, i32) {
    %c0_i32 = arith.constant 0 : i32
    %c0_i32_0 = arith.constant 0 : i32
    return %arg0, %c0_i32 : i32, i32
  }
}

</mosaic_0001>

<bundles_post_ra>
// kernel: loss_forward.1
= control target key start
LH: loop header
LB: loop body
LE: loop exit
PB: predicated region body
PF: predicated region fallthrough
CT: control target
= control target key end

     0   :  { %s1164_s9 = smov 0   ;;  %s1973_s0 = inlined_call_operand.vmem [shape: f32[256,1000], index: 0, kind: input, shape index: {}]   ;;  %s1974_s1 = inlined_call_operand.vmem [shape: s32[256,1], index: 1, kind: input, shape index: {}]   ;;  %s1975_s2 = inlined_call_operand.vmem [shape: f32[256,1], index: 2, kind: output, shape index: {}]  }
   0x1 LB: > { %s947_s10 = sadd.s32 4294967295, %s1146_s9   ;;  %p951_p0 = scmp.ge.s32.totalorder %s1146_s9, 1  ;;  %s1146_s9 = sphi %s1164_s9, %s12_s9  }
   0x2   : > { %p125_p1 = scmp.lt.s32.totalorder %s1146_s9, 5 }
   0x4   : > { %p126_p2 = pnand %p951_p0, %p125_p1 }
   0x6   : > { %129 = sbr.rel (%p126_p2) target bundleno = 402 (0x192), region = 28 }
   0xb   : > { %s952_s11 = sshll.u32 %s947_s10, 3  ;;  %v1148_v20 = vmov 0   ;;  %vm250_vm0 = vcmask 850944  }
   0xc   : > { %p154_p3 = scmp.lt.s32.totalorder %s952_s11, 31  ;;  %972 = vset.pattern.permute.xlu0 %v1148_v20  ;;  %973 = vset.pattern.permute.xlu1 %v1148_v20 }
   0xd   : > { %971 = vset.pattern.permute.xlu2 %v1148_v20 }
   0xe   : > { %s2139_s11 = smov (!%p154_p3, %s952_s11), 31 }
   0xf   : > { %s961_s12 = sshll.u32 %s2139_s11, 6  ;;  %s956_s16 = sshll.u32 %s2139_s11, 3 }
  0x10   : > { %s1178_s15 = scalar_lea.vmem %s1973_s0, %s961_s12  ;;  %s164_s19 = scalar_lea.vmem %s1974_s1, %s956_s16 }
  0x11   : > { %v1181_v0 = vld [vmem:[%s1178_s15 + $0x100] sm:$0xff]  ;;  %v1184_v1 = vld [vmem:[%s1178_s15 + $0x108] sm:$0xff]  ;;  %v1187_v2 = vld [vmem:[%s1178_s15 + $0x110] sm:$0xff]  ;;  %s1945_s22 = scalar_lea.vmem %s1975_s2, %s956_s16 }
  0x12   : > { %v285_v3 = vmax.f32 %v1181_v0, %v1184_v1  ;;  %v1192_v4 = vld [vmem:[%s1178_s15 + $0x118] sm:$0xff]  ;;  %v1195_v5 = vld [vmem:[%s1178_s15 + $0x80] sm:$0xff]  ;;  %v1199_v7 = vld [vmem:[%s1178_s15 + $0x88] sm:$0xff] }
  0x13   : > { %2039 = vst [vmem:[#allocation2_spill] sm:$0xff] %v1195_v5  ;;  %v1202_v8 = vld [vmem:[%s1178_s15 + $0x90] sm:$0xff]  ;;  %v1205_v9 = vld [vmem:[%s1178_s15 + $0x120] sm:$0xff]  ;;  %v265_v10 = vmax.f32 %v1195_v5, %v1199_v7  ;;  %v1211_v12 = vld [vmem:[%s1178_s15 + $0x98] sm:$0xff] }
  0x14   : > { %v286_v6 = vmax.f32 %v285_v3, %v1187_v2  ;;  %2040 = vst [vmem:[#allocation3_spill] sm:$0xff] %v1199_v7  ;;  %v1214_v13 = vld [vmem:[%s1178_s15] sm:$0xff]  ;;  %v1217_v14 = vld [vmem:[%s1178_s15 + $0x8] sm:$0xff]  ;;  %v1223_v16 = vld [vmem:[%s1178_s15 + $0x130] sm:$0xff] }
  0x15   : > { %2041 = vst [vmem:[#allocation4_spill] sm:$0xff] %v1202_v8  ;;  %v1220_v15 = vld [vmem:[%s1178_s15 + $0x128] sm:$0xff]  ;;  %v266_v17 = vmax.f32 %v265_v10, %v1202_v8  ;;  %v1227_v18 = vld [vmem:[%s1178_s15 + $0x10] sm:$0xff]  ;;  %v244_v19 = vmax.f32 %v1214_v13, %v1217_v14  ;;  %v1232_v21 = vld [vmem:[%s1178_s15 + $0x138] sm:$0xff] }
  0x16   : > { %v287_v11 = vmax.f32 %v286_v6, %v1192_v4  ;;  %2042 = vst [vmem:[#allocation5_spill] sm:$0xff] %v1211_v12  ;;  %v1236_v23 = vld [vmem:[%s1178_s15 + $0xa0] sm:$0xff]  ;;  %v1239_v24 = vld [vmem:[%s1178_s15 + $0x18] sm:$0xff]  ;;  %v1247_v28 = vld [vmem:[%s1178_s15 + $0x148] sm:$0xff]  ;;  %v291_v35 = vsel %vm250_vm0, %v1232_v21, -inf }
  0x17   : > { %2043 = vst [vmem:[#allocation6_spill] sm:$0xff] %v1214_v13  ;;  %v267_v25 = vmax.f32 %v266_v17, %v1211_v12  ;;  %v245_v26 = vmax.f32 %v244_v19, %v1227_v18  ;;  %v1244_v27 = vld [vmem:[%s1178_s15 + $0x140] sm:$0xff]  ;;  %v1250_v29 = vld [vmem:[%s1178_s15 + $0x150] sm:$0xff]  ;;  %v1254_v31 = vld [vmem:[%s1178_s15 + $0xa8] sm:$0xff] }
  0x18   : > { %2044 = vst [vmem:[#allocation7_spill] sm:$0xff] %v1217_v14  ;;  %v288_v22 = vmax.f32 %v287_v11, %v1205_v9  ;;  %v1257_v32 = vld [vmem:[%s1178_s15 + $0xb0] sm:$0xff]  ;;  %v1260_v33 = vld [vmem:[%s1178_s15 + $0x20] sm:$0xff]  ;;  %v295_v34 = vmax.f32 %v1244_v27, %v1247_v28  ;;  %v1267_v36 = vld [vmem:[%s1178_s15 + $0xb8] sm:$0xff] }
  0x19   : > { %2045 = vst [vmem:[#allocation8_spill] sm:$0xff] %v1227_v18  ;;  %v268_v37 = vmax.f32 %v267_v25, %v1236_v23  ;;  %v246_v38 = vmax.f32 %v245_v26, %v1239_v24  ;;  %v1272_v39 = vld [vmem:[%s1178_s15 + $0x158] sm:$0xff]  ;;  %v1275_v40 = vld [vmem:[%s1178_s15 + $0xc0] sm:$0xff]  ;;  %v1279_v42 = vld [vmem:[%s1178_s15 + $0x28] sm:$0xff]  ;;  %v271_v53 = vsel %vm250_vm0, %v1267_v36, -inf }
  0x1a   : > { %2046 = vst [vmem:[#allocation9_spill] sm:$0xff] %v1236_v23  ;;  %v289_v30 = vmax.f32 %v288_v22, %v1220_v15  ;;  %v296_v43 = vmax.f32 %v295_v34, %v1250_v29  ;;  %v1283_v44 = vld [vmem:[%s1178_s15 + $0xc8] sm:$0xff]  ;;  %v1286_v45 = vld [vmem:[%s1178_s15 + $0xd0] sm:$0xff]  ;;  %v1293_v48 = vld [vmem:[%s1178_s15 + $0x38] sm:$0xff] }
  0x1b   : > { %2047 = vst [vmem:[#allocation10_spill] sm:$0xff] %v1239_v24  ;;  %v269_v46 = vmax.f32 %v268_v37, %v1254_v31  ;;  %v1290_v47 = vld [vmem:[%s1178_s15 + $0x30] sm:$0xff]  ;;  %v247_v49 = vmax.f32 %v246_v38, %v1260_v33  ;;  %v1297_v50 = vld [vmem:[%s1178_s15 + $0x160] sm:$0xff]  ;;  %v275_v51 = vmax.f32 %v1275_v40, %v1283_v44  ;;  %v1305_v55 = vld [vmem:[%s1178_s15 + $0xd8] sm:$0xff]  ;;  %v251_v3 = vsel %vm250_vm0, %v1293_v48, -inf }
  0x1c   : > { %2048 = vst [vmem:[#allocation11_spill] sm:$0xff] %v1254_v31  ;;  %v290_v41 = vmax.f32 %v289_v30, %v1223_v16  ;;  %v297_v54 = vmax.f32 %v296_v43, %v1272_v39  ;;  %v1308_v56 = vld [vmem:[%s1178_s15 + $0x40] sm:$0xff]  ;;  %v1311_v57 = vld [vmem:[%s1178_s15 + $0x48] sm:$0xff]  ;;  %v1319_v61 = vld [vmem:[%s1178_s15 + $0x170] sm:$0xff] }
  0x1d   : > { %2049 = vst [vmem:[#allocation12_spill] sm:$0xff] %v1257_v32  ;;  %v270_v58 = vmax.f32 %v269_v46, %v1257_v32  ;;  %v248_v59 = vmax.f32 %v247_v49, %v1279_v42  ;;  %v1316_v60 = vld [vmem:[%s1178_s15 + $0x168] sm:$0xff]  ;;  %v276_v62 = vmax.f32 %v275_v51, %v1286_v45  ;;  %v1323_v63 = vld [vmem:[%s1178_s15 + $0x50] sm:$0xff]  ;;  %v1328_v6 = vld [vmem:[%s1178_s15 + $0x178] sm:$0xff]  ;;  %v255_v19 = vmax.f32 %v1308_v56, %v1311_v57 }
  0x1e   : > { %2050 = vst [vmem:[#allocation13_spill] sm:$0xff] %v1260_v33  ;;  %v292_v52 = vmax.f32 %v290_v41, %v291_v35  ;;  %v298_v10 = vmax.f32 %v297_v54, %v1297_v50  ;;  %v1332_v11 = vld [vmem:[%s1178_s15 + $0xe0] sm:$0xff]  ;;  %v1335_v17 = vld [vmem:[%s1178_s15 + $0x58] sm:$0xff]  ;;  %v237_v30 = vld [vmem:[%s1178_s15 + $0x1c8] sm:$0xff]  ;;  %v301_v49 = vsel %vm250_vm0, %v1328_v6, -inf }
  0x1f   : > { %2051 = vst [vmem:[#allocation14_spill] sm:$0xff] %v1267_v36  ;;  %v272_v20 = vmax.f32 %v270_v58, %v271_v53  ;;  %v249_v22 = vmax.f32 %v248_v59, %v1290_v47  ;;  %v277_v25 = vmax.f32 %v276_v62, %v1305_v55  ;;  %v236_v26 = vld [vmem:[%s1178_s15 + $0x1c0] sm:$0xff]  ;;  %v238_v34 = vld [vmem:[%s1178_s15 + $0x1d0] sm:$0xff]  ;;  %v1346_v37 = vld [vmem:[%s1178_s15 + $0xe8] sm:$0xff]  ;;  %v256_v41 = vmax.f32 %v255_v19, %v1323_v63 }
  0x20   : > { %2052 = vst [vmem:[#allocation15_spill] sm:$0xff] %v1275_v40  ;;  %293 = vmax.xlane.f32.xlu2 %v292_v52  ;;  %v299_v35 = vmax.f32 %v298_v10, %v1316_v60  ;;  %v1349_v38 = vld [vmem:[%s1178_s15 + $0xf8] sm:$0xff]  ;;  %v315_v43 = vmax.f32 %v236_v26, %v237_v30  ;;  %v1356_v52 = vld [vmem:[%s1178_s15 + $0x60] sm:$0xff]  ;;  %v1366_v59 = vld [vmem:[%s1178_s15 + $0xf0] sm:$0xff] }
  0x21   : > { %2053 = vst [vmem:[#allocation16_spill] sm:$0xff] %v1283_v44  ;;  %273 = vmax.xlane.f32.xlu1 %v272_v20  ;;  %v252_v46 = vmax.f32 %v249_v22, %v251_v3  ;;  %v278_v51 = vmax.f32 %v277_v25, %v1332_v11  ;;  %v1359_v53 = vld [vmem:[%s1178_s15 + $0x1d8] sm:$0xff]  ;;  %v1362_v54 = vld [vmem:[%s1178_s15 + $0x180] sm:$0xff]  ;;  %v257_v62 = vmax.f32 %v256_v41, %v1335_v17  ;;  %v1370_v10 = vld [vmem:[%s1178_s15 + $0x188] sm:$0xff] }
  0x22   : > { %2054 = vst [vmem:[#allocation17_spill] sm:$0xff] %v1286_v45  ;;  %v300_v58 = vmax.f32 %v299_v35, %v1319_v61  ;;  %v316_v3 = vmax.f32 %v315_v43, %v238_v34  ;;  %v1373_v19 = vld [vmem:[%s1178_s15 + $0x190] sm:$0xff]  ;;  %v1377_v22 = vld [vmem:[%s1178_s15 + $0x68] sm:$0xff]  ;;  %v1380_v25 = vld [vmem:[%s1178_s15 + $0x1e0] sm:$0xff]  ;;  %v305_v26 = vmax.f32 %v1362_v54, %v1370_v10  ;;  %v281_v34 = vsel %vm250_vm0, %v1349_v38, -inf }
  0x23   : > { %2055 = vst [vmem:[#allocation18_spill] sm:$0xff] %v1305_v55  ;;  %253 = vmax.xlane.f32.xlu0 %v252_v46  ;;  %v279_v20 = vmax.f32 %v278_v51, %v1346_v37  ;;  %v1387_v35 = vld [vmem:[%s1178_s15 + $0x78] sm:$0xff]  ;;  %v258_v41 = vmax.f32 %v257_v62, %v1356_v52  ;;  %v1405_v62 = vld [vmem:[%s1178_s15 + $0x1a0] sm:$0xff]  ;;  %v1426_v45 = vld [vmem:[%s1178_s15 + $0x1b0] sm:$0xff] }
  0x24   : > { %2056 = vst [vmem:[#allocation19_spill] sm:$0xff] %v1308_v56  ;;  %v302_v30 = vmax.f32 %v300_v58, %v301_v49  ;;  %v317_v43 = vmax.f32 %v316_v3, %v1359_v53  ;;  %v1392_v46 = vld [vmem:[%s1178_s15 + $0x198] sm:$0xff]  ;;  %v306_v49 = vmax.f32 %v305_v26, %v1373_v19 }
  0x25   : > { %2057 = vst [vmem:[#allocation20_spill] sm:$0xff] %v1311_v57  ;;  %v280_v51 = vmax.f32 %v279_v20, %v1366_v59  ;;  %v259_v58 = vmax.f32 %v258_v41, %v1377_v22  ;;  %v1410_v20 = vld [vmem:[%s1178_s15 + $0x1f0] sm:$0xff]  ;;  %v1419_v41 = vld [vmem:[%s1178_s15 + $0x1a8] sm:$0xff] }
  0x26   : > { %2058 = vst [vmem:[#allocation21_spill] sm:$0xff] %v1323_v63  ;;  %v307_v55 = vmax.f32 %v306_v49, %v1392_v46  ;;  %v1429_v49 = vld [vmem:[%s1178_s15 + $0x1b8] sm:$0xff] }
  0x27   : > { %2059 = vst [vmem:[#allocation22_spill] sm:$0xff] %v1332_v11  ;;  %v1399_v11 = vld [vmem:[%s1178_s15 + $0x1e8] sm:$0xff]  ;;  %v282_v3 = vmax.f32 %v280_v51, %v281_v34 }
  0x28   : > { %2060 = vst [vmem:[#allocation23_spill] sm:$0xff] %v1335_v17  ;;  %303 = vmax.xlane.f32.xlu2 %v302_v30  ;;  %v308_v34 = vmax.f32 %v307_v55, %v1405_v62 }
  0x29   : > { %2061 = vst [vmem:[#allocation24_spill] sm:$0xff] %v1346_v37  ;;  %v1396_v37 = vld [vmem:[%s1178_s15 + $0x70] sm:$0xff]  ;;  %283 = vmax.xlane.f32.xlu1 %v282_v3  ;;  %v311_v3 = vsel %vm250_vm0, %v1429_v49, -inf }
  0x2a   : > { %2062 = vst [vmem:[#allocation25_spill] sm:$0xff] %v1349_v38  ;;  %v318_v38 = vmax.f32 %v317_v43, %v1380_v25  ;;  %v260_v26 = vmax.f32 %v259_v58, %v1396_v37  ;;  %v309_v58 = vmax.f32 %v308_v34, %v1419_v41  ;;  %v176_v34 = vld [vmem:[%s164_s19 + $0x20] sm:$0xff] }
  0x2b   : > { %2063 = vst [vmem:[#allocation26_spill] sm:$0xff] %v1356_v52 }
  0x2c   : > { %2064 = vst [vmem:[#allocation27_spill] sm:$0xff] %v1359_v53  ;;  %v261_v53 = vsel %vm250_vm0, %v1387_v35, -inf  ;;  %v319_v30 = vmax.f32 %v318_v38, %v1399_v11 }
  0x2d   : > { %2065 = vst [vmem:[#allocation28_spill] sm:$0xff] %v1366_v59  ;;  %v1413_v59 = vld [vmem:[%s1178_s15 + $0x1f8] sm:$0xff]  ;;  %v262_v43 = vmax.f32 %v260_v26, %v261_v53  ;;  %v172_v53 = vld [vmem:[%s164_s19] sm:$0xff] }
  0x2e   : > { %2066 = vst [vmem:[#allocation29_spill] sm:$0xff] %v1377_v22  ;;  %v320_v51 = vmax.f32 %v319_v30, %v1410_v20  ;;  %v175_v26 = vld [vmem:[%s164_s19 + $0x18] sm:$0xff]  ;;  %v173_v30 = vld [vmem:[%s164_s19 + $0x8] sm:$0xff] }
  0x2f   : > { %2067 = vst [vmem:[#allocation30_spill] sm:$0xff] %v1380_v25  ;;  %v321_v25 = vsel %vm250_vm0, %v1413_v59, -inf  ;;  %263 = vmax.xlane.f32.xlu0 %v262_v43  ;;  %v177_v43 = vld [vmem:[%s164_s19 + $0x28] sm:$0xff] }
  0x30   : > { %2068 = vst [vmem:[#allocation31_spill] sm:$0xff] %v1387_v35  ;;  %v322_v38 = vmax.f32 %v320_v51, %v321_v25  ;;  %v174_v25 = vld [vmem:[%s164_s19 + $0x10] sm:$0xff]  ;;  %v179_v51 = vld [vmem:[%s164_s19 + $0x38] sm:$0xff] }
  0x31   : > { %2069 = vst [vmem:[#allocation32_spill] sm:$0xff] %v1392_v46 }
  0x32   : > { %2070 = vst [vmem:[#allocation33_spill] sm:$0xff] %v1396_v37  ;;  %323 = vmax.xlane.f32.xlu1 %v322_v38 }
  0x33   : > { %2071 = vst [vmem:[#allocation34_spill] sm:$0xff] %v1399_v11  ;;  %v310_v11 = vmax.f32 %v309_v58, %v1426_v45  ;;  %v597_v58 = vlaneseq }
  0x34   : > { %2072 = vst [vmem:[#allocation35_spill] sm:$0xff] %v1405_v62 }
  0x35   : > { %2073 = vst [vmem:[#allocation36_spill] sm:$0xff] %v1410_v20  ;;  %v312_v55 = vmax.f32 %v310_v11, %v311_v3  ;;  %v178_v11 = vld [vmem:[%s164_s19 + $0x30] sm:$0xff]  ;;  %v1441_v38 = vand.u32 127, %v597_v58 }
  0x36   : > { %2074 = vst [vmem:[#allocation37_spill] sm:$0xff] %v1413_v59 }
  0x37   : > { %2075 = vst [vmem:[#allocation38_spill] sm:$0xff] %v1419_v41  ;;  %313 = vmax.xlane.f32.xlu0 %v312_v55  ;;  %v1446_v55 = vadd.s32 128, %v1441_v38 }
  0x38   : > { %2076 = vst [vmem:[#allocation39_spill] sm:$0xff] %v1426_v45  ;;  %v1485_v45 = vadd.s32 768, %v1441_v38 }
  0x39   : > { %2077 = vst [vmem:[#allocation40_spill] sm:$0xff] %v1429_v49 }
  0x40   : > { %607 = vperm.xlu2 %971, %v172_v53  }
  0x48   : > { %616 = vperm.xlu2 %971, %v175_v26   ;;  %v1451_v26 = vadd.s32 256, %v1441_v38 }
  0x4b   : > { %610 = vperm.xlu0 %972, %v173_v30   ;;  %613 = vperm.xlu1 %973, %v174_v25   ;;  %v1454_v30 = vadd.s32 384, %v1441_v38  ;;  %v1457_v25 = vadd.s32 512, %v1441_v38 }
  0x4d   : > { %2080 = vst [vmem:[#allocation43_spill] sm:$0xff] %v1454_v30 }
  0x4e   : > { %2081 = vst [vmem:[#allocation44_spill] sm:$0xff] %v1457_v25 }
  0x50   : > { %619 = vperm.xlu2 %971, %v176_v34   ;;  %v1460_v34 = vadd.s32 640, %v1441_v38 }
  0x52   : > { %2082 = vst [vmem:[#allocation45_spill] sm:$0xff] %v1460_v34 }
  0x53   : > { %622 = vperm.xlu1 %973, %v177_v43  }
  0x58   : > { %625 = vperm.xlu2 %971, %v178_v11  }
  0x5b   : > { %628 = vperm.xlu1 %973, %v179_v51  }
  0x93   : > { %v1443_v3 = vpop.xlane.xlu2 %293 }
  0x94   : > { %2078 = vst [vmem:[#allocation41_spill] sm:$0xff] %v1443_v3  ;;  %v1448_v53 = vpop.xlane.xlu1 %273  ;;  %v361_v62 = vsub.f32 %v1205_v9, %v1443_v3 }
  0x95   : > { %2079 = vst [vmem:[#allocation42_spill] sm:$0xff] %v1448_v53  ;;  %v341_v43 = vsub.f32 %v1195_v5, %v1448_v53  ;;  %v342_v11 = vsub.f32 %v1199_v7, %v1448_v53  ;;  %v343_v51 = vsub.f32 %v1202_v8, %v1448_v53  ;;  %v344_v58 = vsub.f32 %v1211_v12, %v1448_v53 }
  0x96   : > { %v1470_v20 = vpop.xlane.xlu0 %253  ;;  %v345_v59 = vsub.f32 %v1236_v23, %v1448_v53  ;;  %v346_v44 = vsub.f32 %v1254_v31, %v1448_v53  ;;  %v347_v5 = vsub.f32 %v1257_v32, %v1448_v53  ;;  %v348_v7 = vsub.f32 %v1267_v36, %v1448_v53 }
  0x97   : > { %2083 = vst [vmem:[#allocation46_spill] sm:$0xff] %v1470_v20  ;;  %v421_v40 = vmul.f32 1.442695, %v341_v43  ;;  %v423_v49 = vmul.f32 1.442695, %v342_v11  ;;  %v357_v8 = vsub.f32 %v1181_v0, %v1443_v3  ;;  %v358_v12 = vsub.f32 %v1184_v1, %v1443_v3 }
  0x98   : > { %v1488_v23 = vadd.s32 896, %v1441_v38  ;;  %v425_v31 = vmul.f32 1.442695, %v343_v51  ;;  %v359_v32 = vsub.f32 %v1187_v2, %v1443_v3  ;;  %v427_v43 = vmul.f32 1.442695, %v344_v58 }
  0x99   : > { %v429_v11 = vmul.f32 1.442695, %v345_v59  ;;  %v431_v53 = vmul.f32 1.442695, %v346_v44  ;;  %v360_v0 = vsub.f32 %v1192_v4, %v1443_v3  ;;  %974 = vpow2.f32 %v421_v40 }
  0x9a   : > { %2084 = vst [vmem:[#allocation47_spill] sm:$0xff] %v1488_v23  ;;  %v433_v1 = vmul.f32 1.442695, %v347_v5  ;;  %v435_v36 = vmul.f32 1.442695, %v348_v7  ;;  %976 = vpow2.f32 %v423_v49  ;;  %v362_v51 = vsub.f32 %v1220_v15, %v1443_v3 }
  0x9b   : > { %v1492_v41 = vpop.xlane.xlu2 %303  ;;  %v1500_v46 = vmul.f32 1.442695, %v357_v8  ;;  %v1502_v2 = vmul.f32 1.442695, %v358_v12  ;;  %978 = vpow2.f32 %v425_v31  ;;  %v363_v7 = vsub.f32 %v1223_v16, %v1443_v3 }
  0x9c   : > { %2085 = vst [vmem:[#allocation48_spill] sm:$0xff] %v1492_v41  ;;  %v365_v44 = vsub.f32 %v1244_v27, %v1492_v41  ;;  %v366_v4 = vsub.f32 %v1247_v28, %v1492_v41  ;;  %v367_v5 = vsub.f32 %v1250_v29, %v1492_v41  ;;  %980 = vpow2.f32 %v427_v43 }
  0x9d   : > { %v1512_v9 = vmul.f32 1.442695, %v359_v32  ;;  %v1514_v8 = vmul.f32 1.442695, %v360_v0  ;;  %982 = vpow2.f32 %v429_v11  ;;  %v1516_v12 = vmul.f32 1.442695, %v361_v62 }
  0x9e   : > { %v1518_v15 = vmul.f32 1.442695, %v362_v51  ;;  %984 = vpow2.f32 %v431_v53  ;;  %v1528_v31 = vmul.f32 1.442695, %v365_v44  ;;  %v1530_v40 = vmul.f32 1.442695, %v363_v7 }
  0x9f   : > { %v975_v32 = vpop.eup %974  ;;  %986 = vpow2.f32 %v433_v1  ;;  %v1532_v59 = vmul.f32 1.442695, %v366_v4  ;;  %v1534_v62 = vmul.f32 1.442695, %v367_v5 }
  0xa0   : > { %v977_v49 = vpop.eup %976  ;;  %988 = vpow2.f32 %v435_v36  ;;  %v370_v36 = vsub.f32 %v1316_v60, %v1492_v41 }
  0xa1   : > { %v979_v1 = vpop.eup %978 }
  0xa2   : > { %v1522_v28 = vpop.xlane.xlu0 %263  ;;  %v981_v51 = vpop.eup %980 }
  0xa3   : > { %2086 = vst [vmem:[#allocation49_spill] sm:$0xff] %v1522_v28  ;;  %v608_v58 = vpop.permute.xlu2 %607  ;;  %v333_v53 = vsub.f32 %v1308_v56, %v1522_v28  ;;  %v334_v43 = vsub.f32 %v1311_v57, %v1522_v28  ;;  %v335_v11 = vsub.f32 %v1323_v63, %v1522_v28  ;;  %v336_v0 = vsub.f32 %v1335_v17, %v1522_v28  ;;  %v983_v7 = vpop.eup %982 }
  0xa4   : > { %vm630_vm1 = vcmp.eq.s32.totalorder %v1441_v38, %v608_v58  ;;  %vm631_vm2 = vcmp.eq.s32.totalorder %v1446_v55, %v608_v58  ;;  %vm632_vm3 = vcmp.eq.s32.totalorder %v1451_v26, %v608_v58  ;;  %vm633_vm4 = vcmp.eq.s32.totalorder %v1454_v30, %v608_v58  ;;  %v985_v20 = vpop.eup %984 }
  0xa5   : > { %vm634_vm5 = vcmp.eq.s32.totalorder %v1457_v25, %v608_v58  ;;  %v337_v44 = vsub.f32 %v1356_v52, %v1522_v28  ;;  %v338_v4 = vsub.f32 %v1377_v22, %v1522_v28  ;;  %v339_v5 = vsub.f32 %v1396_v37, %v1522_v28  ;;  %v987_v37 = vpop.eup %986 }
  0xa6   : > { %vm635_vm6 = vcmp.eq.s32.totalorder %v1460_v34, %v608_v58  ;;  %v694_v27 = vsel %vm630_vm1, %v1214_v13, 0.0  ;;  %v695_v16 = vsel %vm631_vm2, %v1217_v14, 0.0  ;;  %v340_v29 = vsub.f32 %v1387_v35, %v1522_v28 }
  0xa7   : > { %vm636_vm7 = vcmp.eq.s32.totalorder %v1485_v45, %v608_v58  ;;  %vm637_vm8 = vcmp.eq.s32.totalorder %v1488_v23, %v608_v58  ;;  %v696_v22 = vsel %vm632_vm3, %v1227_v18, 0.0  ;;  %v697_v52 = vsel %vm633_vm4, %v1239_v24, 0.0 }
  0xa8   : > { %v698_v17 = vsel %vm634_vm5, %v1260_v33, 0.0  ;;  %v758_v63 = vadd.f32 %v695_v16, %v694_v27  ;;  %v405_v57 = vmul.f32 1.442695, %v333_v53  ;;  %v407_v13 = vmul.f32 1.442695, %v334_v43 }
  0xa9   : > { %v699_v14 = vsel %vm635_vm6, %v1279_v42, 0.0  ;;  %v409_v56 = vmul.f32 1.442695, %v335_v11  ;;  %v411_v34 = vmul.f32 1.442695, %v336_v0  ;;  %v701_v28 = vsel %vm637_vm8, %v1293_v48, 0.0 }
  0xaa   : > { %v759_v35 = vadd.f32 %v758_v63, %v696_v22  ;;  %990 = vpow2.f32 %v405_v57  ;;  %v413_v23 = vmul.f32 1.442695, %v337_v44  ;;  %v415_v18 = vmul.f32 1.442695, %v338_v4 }
  0xab   : > { %992 = vpow2.f32 %v407_v13  ;;  %v417_v25 = vmul.f32 1.442695, %v339_v5  ;;  %v537_v24 = vadd.f32 %v977_v49, %v975_v32  ;;  %v419_v33 = vmul.f32 1.442695, %v340_v29  ;;  %v1582_v32 = vpop.xlane.xlu0 %313 }
  0xac   : > { %v760_v30 = vadd.f32 %v759_v35, %v697_v52  ;;  %994 = vpow2.f32 %v409_v56  ;;  %v369_v27 = vsub.f32 %v1297_v50, %v1492_v41  ;;  %v371_v63 = vsub.f32 %v1319_v61, %v1492_v41  ;;  %v989_v56 = vpop.eup %988 }
  0xad   : > { %996 = vpow2.f32 %v411_v34  ;;  %v538_v16 = vadd.f32 %v979_v1, %v537_v24  ;;  %v700_v13 = vsel %vm636_vm7, %v1290_v47, 0.0  ;;  %v764_v52 = vsel %vm250_vm0, %v701_v28, 0.0 }
  0xae   : > { %v761_v57 = vadd.f32 %v760_v30, %v698_v17  ;;  %998 = vpow2.f32 %v413_v23  ;;  %v2087_v24 = vsub.f32 %v1232_v21, %v1443_v3  ;;  %v372_v34 = vsub.f32 %v1328_v6, %v1492_v41 }
  0xaf   : > { %1000 = vpow2.f32 %v415_v18  ;;  %v539_v22 = vadd.f32 %v981_v51, %v538_v16  ;;  %v2088_v17 = vsub.f32 %v1272_v39, %v1492_v41  ;;  %v1589_v23 = vmul.f32 1.442695, %v369_v27 }
  0xb0   : > { %v467_v35 = vmul.f32 1.442695, %v2087_v24  ;;  %v991_v29 = vpop.eup %990  ;;  %v762_v49 = vadd.f32 %v761_v57, %v699_v14  ;;  %1002 = vpow2.f32 %v417_v25  ;;  %v1591_v21 = vmul.f32 1.442695, %v370_v36 }
  0xb1   : > { %v1587_v30 = vmul.f32 1.442695, %v2088_v17  ;;  %v993_v18 = vpop.eup %992  ;;  %1004 = vpow2.f32 %v419_v33  ;;  %v540_v28 = vadd.f32 %v983_v7, %v539_v22  ;;  %v1593_v58 = vmul.f32 1.442695, %v371_v63  ;;  %v2093_v22 = vld [vmem:[#allocation40_spill] sm:$0xff] }
  0xb2   : > { %v995_v53 = vpop.eup %994  ;;  %v763_v43 = vadd.f32 %v762_v49, %v700_v13  ;;  %v527_v11 = vadd.f32 %v993_v18, %v991_v29  ;;  %v543_v14 = vsel %vm250_vm0, %v989_v56, 0.0  ;;  %1006 = vpow2.f32 %v1500_v46  ;;  %v2091_v13 = vld [vmem:[#allocation38_spill] sm:$0xff] }
  0xb3   : > { %v997_v25 = vpop.eup %996  ;;  %v541_v0 = vadd.f32 %v985_v20, %v540_v28  ;;  %1008 = vpow2.f32 %v1502_v2  ;;  %v1598_v1 = vmul.f32 1.442695, %v372_v34  ;;  %v373_v33 = vsub.f32 %v1362_v54, %v1582_v32  ;;  %v2089_v20 = vld [vmem:[#allocation32_spill] sm:$0xff] }
  0xb4   : > { %v999_v51 = vpop.eup %998  ;;  %v765_v44 = vadd.f32 %v764_v52, %v763_v43  ;;  %v528_v4 = vadd.f32 %v995_v53, %v527_v11  ;;  %1010 = vpow2.f32 %v1512_v9  ;;  %v374_v5 = vsub.f32 %v1370_v10, %v1582_v32  ;;  %v2090_v9 = vld [vmem:[#allocation35_spill] sm:$0xff]  ;;  %v1615_v52 = vpop.xlane.xlu1 %283 }
  0xb5   : > { %v1001_v7 = vpop.eup %1000  ;;  %v542_v27 = vadd.f32 %v987_v37, %v541_v0  ;;  %1012 = vpow2.f32 %v1514_v8  ;;  %v375_v46 = vsub.f32 %v1373_v19, %v1582_v32  ;;  %v376_v2 = vsub.f32 %v2089_v20, %v1582_v32  ;;  %v2092_v8 = vld [vmem:[#allocation39_spill] sm:$0xff] }
  0xb6   : > { %v1003_v16 = vpop.eup %1002  ;;  %766 = vadd.xlane.f32.xlu1 %v765_v44  ;;  %v529_v36 = vadd.f32 %v997_v25, %v528_v4  ;;  %1014 = vpow2.f32 %v1516_v12  ;;  %v377_v63 = vsub.f32 %v2090_v9, %v1582_v32  ;;  %v378_v57 = vsub.f32 %v2091_v13, %v1582_v32 }
  0xb7   : > { %v1005_v37 = vpop.eup %1004  ;;  %1016 = vpow2.f32 %v1518_v15  ;;  %v379_v56 = vsub.f32 %v2092_v8, %v1582_v32  ;;  %v380_v24 = vsub.f32 %v2093_v22, %v1582_v32  ;;  %v1622_v34 = vmul.f32 1.442695, %v373_v33 }
  0xb8   : > { %v1007_v12 = vpop.eup %1006  ;;  %v530_v29 = vadd.f32 %v999_v51, %v529_v36  ;;  %v544_v49 = vadd.f32 %v543_v14, %v542_v27  ;;  %1018 = vpow2.f32 %v1530_v40  ;;  %v487_v17 = vmul.f32 1.442695, %v374_v5  ;;  %v1633_v14 = vpop.permute.xlu2 %616 }
  0xb9   : > { %v1009_v18 = vpop.eup %1008  ;;  %v533_v28 = vsel %vm250_vm0, %v1005_v37, 0.0  ;;  %1020 = vpow2.f32 %v467_v35  ;;  %v1626_v53 = vmul.f32 1.442695, %v375_v46  ;;  %v1628_v15 = vmul.f32 1.442695, %v376_v2  ;;  %v2095_v2 = vld [vmem:[#allocation44_spill] sm:$0xff] }
  0xba   : > { %v1011_v43 = vpop.eup %1010  ;;  %v531_v11 = vadd.f32 %v1001_v7, %v530_v29  ;;  %v557_v25 = vadd.f32 %v1009_v18, %v1007_v12  ;;  %1022 = vpow2.f32 %v1528_v31  ;;  %v1631_v0 = vmul.f32 1.442695, %v377_v63  ;;  %v2099_v12 = vld [vmem:[#allocation20_spill] sm:$0xff] }
  0xbb   : > { %v1013_v33 = vpop.eup %1012  ;;  %1024 = vpow2.f32 %v1532_v59  ;;  %v1636_v40 = vmul.f32 1.442695, %v378_v57  ;;  %v1638_v51 = vmul.f32 1.442695, %v379_v56  ;;  %v1640_v35 = vmul.f32 1.442695, %v380_v24 }
  0xbc   : > { %v1015_v44 = vpop.eup %1014  ;;  %v532_v4 = vadd.f32 %v1003_v16, %v531_v11  ;;  %v558_v7 = vadd.f32 %v1011_v43, %v557_v25  ;;  %1026 = vpow2.f32 %v1534_v62  ;;  %vm654_vm9 = vcmp.eq.s32.totalorder %v1441_v38, %v1633_v14  ;;  %v2094_v62 = vld [vmem:[#allocation43_spill] sm:$0xff]  ;;  %v2096_v16 = vld [vmem:[#allocation45_spill] sm:$0xff] }
  0xbd   : > { %v611_v5 = vpop.permute.xlu0 %610  ;;  %v1017_v31 = vpop.eup %1016  ;;  %1028 = vpow2.f32 %v1587_v30  ;;  %vm655_vm13 = vcmp.eq.s32.totalorder %v1446_v55, %v1633_v14  ;;  %vm656_vm15 = vcmp.eq.s32.totalorder %v1451_v26, %v1633_v14  ;;  %vm657_vm1 = vcmp.eq.s32.totalorder %v2094_v62, %v1633_v14  ;;  %v2097_v57 = vld [vmem:[#allocation47_spill] sm:$0xff] }
  0xbe   : > { %vm638_vm10 = vcmp.eq.s32.totalorder %v1441_v38, %v611_v5  ;;  %vm639_vm11 = vcmp.eq.s32.totalorder %v1446_v55, %v611_v5  ;;  %vm640_vm12 = vcmp.eq.s32.totalorder %v1451_v26, %v611_v5  ;;  %v1019_v59 = vpop.eup %1018  ;;  %v534_v27 = vadd.f32 %v533_v28, %v532_v4  ;;  %545 = vadd.xlane.f32.xlu1 %v544_v49  ;;  %v2098_v56 = vld [vmem:[#allocation19_spill] sm:$0xff]  ;;  %v2100_v49 = vld [vmem:[#allocation21_spill] sm:$0xff] }
  0xbf   : > { %v559_v46 = vadd.f32 %v1013_v33, %v558_v7  ;;  %1030 = vpow2.f32 %v1589_v23  ;;  %vm641_vm14 = vcmp.eq.s32.totalorder %v2094_v62, %v611_v5  ;;  %v1021_v30 = vpop.eup %1020  ;;  %vm642_vm2 = vcmp.eq.s32.totalorder %v2095_v2, %v611_v5  ;;  %v2101_v11 = vld [vmem:[#allocation23_spill] sm:$0xff]  ;;  %v2102_v33 = vld [vmem:[#allocation26_spill] sm:$0xff]  ;;  %v2103_v4 = vld [vmem:[#allocation29_spill] sm:$0xff] }
  0xc0   : > { %1032 = vpow2.f32 %v1591_v21  ;;  %vm643_vm3 = vcmp.eq.s32.totalorder %v2096_v16, %v611_v5  ;;  %vm644_vm4 = vcmp.eq.s32.totalorder %v1485_v45, %v611_v5  ;;  %vm658_vm5 = vcmp.eq.s32.totalorder %v2095_v2, %v1633_v14  ;;  %v1023_v23 = vpop.eup %1022  ;;  %535 = vadd.xlane.f32.xlu0 %v534_v27  ;;  %v1666_v21 = vpop.xlane.xlu1 %323  ;;  %v2104_v27 = vld [vmem:[#allocation33_spill] sm:$0xff] }
  0xc1   : > { %v560_v36 = vadd.f32 %v1015_v44, %v559_v46  ;;  %v563_v63 = vsel %vm250_vm0, %v1021_v30, 0.0  ;;  %1034 = vpow2.f32 %v1593_v58  ;;  %vm645_vm6 = vcmp.eq.s32.totalorder %v2097_v57, %v611_v5  ;;  %v1025_v37 = vpop.eup %1024 }
  0xc2   : > { %1036 = vpow2.f32 %v1598_v1  ;;  %v702_v24 = vsel %vm638_vm10, %v2098_v56, 0.0  ;;  %v703_v29 = vsel %vm639_vm11, %v2099_v12, 0.0  ;;  %v704_v18 = vsel %vm640_vm12, %v2100_v49, 0.0  ;;  %v1027_v58 = vpop.eup %1026 }
  0xc3   : > { %v561_v28 = vadd.f32 %v1017_v31, %v560_v36  ;;  %v567_v43 = vadd.f32 %v1025_v37, %v1023_v23  ;;  %1038 = vpow2.f32 %v1622_v34  ;;  %v705_v1 = vsel %vm641_vm14, %v2101_v11, 0.0  ;;  %v1029_v25 = vpop.eup %1028  ;;  %v2105_v23 = vld [vmem:[#allocation31_spill] sm:$0xff] }
  0xc4   : > { %1040 = vpow2.f32 %v487_v17  ;;  %v706_v44 = vsel %vm642_vm2, %v2102_v33, 0.0  ;;  %v707_v7 = vsel %vm643_vm3, %v2103_v4, 0.0  ;;  %v708_v31 = vsel %vm644_vm4, %v2104_v27, 0.0  ;;  %v2109_v33 = vld [vmem:[#allocation18_spill] sm:$0xff] }
  0xc5   : > { %v1031_v46 = vpop.eup %1030  ;;  %v562_v34 = vadd.f32 %v1019_v59, %v561_v28  ;;  %v568_v30 = vadd.f32 %v1027_v58, %v567_v43  ;;  %1042 = vpow2.f32 %v1626_v53  ;;  %v709_v17 = vsel %vm645_vm6, %v2105_v23, 0.0  ;;  %v2108_v43 = vld [vmem:[#allocation17_spill] sm:$0xff] }
  0xc6   : > { %v1033_v36 = vpop.eup %1032  ;;  %1044 = vpow2.f32 %v1628_v15  ;;  %v768_v37 = vadd.f32 %v703_v29, %v702_v24  ;;  %v774_v56 = vsel %vm250_vm0, %v709_v17, 0.0  ;;  %vm659_vm7 = vcmp.eq.s32.totalorder %v2096_v16, %v1633_v14  ;;  %v2106_v15 = vld [vmem:[#allocation15_spill] sm:$0xff]  ;;  %v2107_v29 = vld [vmem:[#allocation16_spill] sm:$0xff]  ;;  %v1732_v17 = vpop.permute.xlu2 %619 }
  0xc7   : > { %v1035_v12 = vpop.eup %1034  ;;  %v564_v49 = vadd.f32 %v563_v63, %v562_v34  ;;  %v569_v11 = vadd.f32 %v1029_v25, %v568_v30  ;;  %1046 = vpow2.f32 %v1631_v0  ;;  %vm660_vm8 = vcmp.eq.s32.totalorder %v1485_v45, %v1633_v14  ;;  %v2110_v34 = vld [vmem:[#allocation22_spill] sm:$0xff] }
  0xc8   : > { %v1037_v53 = vpop.eup %1036  ;;  %1048 = vpow2.f32 %v1636_v40  ;;  %v769_v5 = vadd.f32 %v768_v37, %v704_v18  ;;  %vm661_vm10 = vcmp.eq.s32.totalorder %v2097_v57, %v1633_v14  ;;  %v718_v59 = vsel %vm654_vm9, %v2106_v15, 0.0  ;;  %v614_v58 = vpop.permute.xlu1 %613 }
  0xc9   : > { %v1039_v24 = vpop.eup %1038  ;;  %565 = vadd.xlane.f32.xlu0 %v564_v49  ;;  %v570_v63 = vadd.f32 %v1031_v46, %v569_v11  ;;  %v573_v0 = vsel %vm250_vm0, %v1037_v53, 0.0  ;;  %1050 = vpow2.f32 %v1638_v51  ;;  %v719_v40 = vsel %vm655_vm13, %v2107_v29, 0.0  ;;  %v2112_v49 = vld [vmem:[#allocation28_spill] sm:$0xff]  ;;  %v2113_v11 = vld [vmem:[#allocation25_spill] sm:$0xff] }
  0xca   : > { %v1041_v18 = vpop.eup %1040  ;;  %1052 = vpow2.f32 %v1640_v35  ;;  %v770_v28 = vadd.f32 %v769_v5, %v705_v1  ;;  %v720_v25 = vsel %vm656_vm15, %v2108_v43, 0.0  ;;  %v721_v51 = vsel %vm657_vm1, %v2109_v33, 0.0  ;;  %v2111_v35 = vld [vmem:[#allocation24_spill] sm:$0xff] }
  0xcb   : > { %v1043_v4 = vpop.eup %1042  ;;  %v571_v27 = vadd.f32 %v1033_v36, %v570_v63  ;;  %v577_v46 = vadd.f32 %v1041_v18, %v1039_v24  ;;  %v722_v30 = vsel %vm658_vm5, %v2110_v34, 0.0  ;;  %v723_v1 = vsel %vm659_vm7, %v2111_v35, 0.0 }
  0xcc   : > { %v1045_v23 = vpop.eup %1044  ;;  %v771_v37 = vadd.f32 %v770_v28, %v706_v44  ;;  %v724_v36 = vsel %vm660_vm8, %v2112_v49, 0.0  ;;  %v725_v53 = vsel %vm661_vm10, %v2113_v11, 0.0  ;;  %v788_v5 = vadd.f32 %v719_v40, %v718_v59 }
  0xcd   : > { %v1047_v15 = vpop.eup %1046  ;;  %v572_v24 = vadd.f32 %v1035_v12, %v571_v27  ;;  %v578_v63 = vadd.f32 %v1043_v4, %v577_v46  ;;  %v794_v29 = vsel %vm250_vm0, %v725_v53, 0.0  ;;  %vm646_vm9 = vcmp.eq.s32.totalorder %v1441_v38, %v614_v58  ;;  %v2115_v46 = vld [vmem:[#allocation3_spill] sm:$0xff]  ;;  %v2118_v53 = vld [vmem:[#allocation9_spill] sm:$0xff] }
  0xce   : > { %v1049_v18 = vpop.eup %1048  ;;  %v772_v44 = vadd.f32 %v771_v37, %v707_v7  ;;  %v789_v28 = vadd.f32 %v788_v5, %v720_v25  ;;  %vm647_vm11 = vcmp.eq.s32.totalorder %v1446_v55, %v614_v58  ;;  %vm648_vm12 = vcmp.eq.s32.totalorder %v1451_v26, %v614_v58  ;;  %v2114_v25 = vld [vmem:[#allocation2_spill] sm:$0xff] }
  0xcf   : > { %v1051_v43 = vpop.eup %1050  ;;  %v574_v3 = vadd.f32 %v573_v0, %v572_v24  ;;  %v579_v41 = vadd.f32 %v1045_v23, %v578_v63  ;;  %vm649_vm13 = vcmp.eq.s32.totalorder %v2094_v62, %v614_v58  ;;  %vm650_vm14 = vcmp.eq.s32.totalorder %v2095_v2, %v614_v58  ;;  %v2120_v24 = vld [vmem:[#allocation12_spill] sm:$0xff] }
  0xd0   : > { %v1053_v14 = vpop.eup %1052  ;;  %v773_v12 = vadd.f32 %v772_v44, %v708_v31  ;;  %v790_v59 = vadd.f32 %v789_v28, %v721_v51  ;;  %vm651_vm15 = vcmp.eq.s32.totalorder %v2096_v16, %v614_v58  ;;  %vm652_vm1 = vcmp.eq.s32.totalorder %v1485_v45, %v614_v58  ;;  %v2116_v51 = vld [vmem:[#allocation4_spill] sm:$0xff]  ;;  %v2121_v44 = vld [vmem:[#allocation14_spill] sm:$0xff] }
  0xd1   : > { %575 = vadd.xlane.f32.xlu1 %v574_v3  ;;  %v580_v7 = vadd.f32 %v1047_v15, %v579_v41  ;;  %v583_v40 = vsel %vm250_vm0, %v1053_v14, 0.0  ;;  %vm653_vm2 = vcmp.eq.s32.totalorder %v2097_v57, %v614_v58  ;;  %v710_v0 = vsel %vm646_vm9, %v2114_v25, 0.0  ;;  %v2117_v41 = vld [vmem:[#allocation5_spill] sm:$0xff]  ;;  %v2119_v15 = vld [vmem:[#allocation11_spill] sm:$0xff] }
  0xd2   : > { %v775_v4 = vadd.f32 %v774_v56, %v773_v12  ;;  %v791_v27 = vadd.f32 %v790_v59, %v722_v30  ;;  %v711_v31 = vsel %vm647_vm11, %v2115_v46, 0.0  ;;  %v712_v23 = vsel %vm648_vm12, %v2116_v51, 0.0  ;;  %v2122_v59 = vld [vmem:[#allocation46_spill] sm:$0xff]  ;;  %v2124_v46 = vld [vmem:[#allocation8_spill] sm:$0xff]  ;;  %v2126_v58 = vld [vmem:[#allocation13_spill] sm:$0xff] }
  0xd3   : > { %v581_v3 = vadd.f32 %v1049_v18, %v580_v7  ;;  %v713_v37 = vsel %vm649_vm13, %v2117_v41, 0.0  ;;  %v714_v5 = vsel %vm650_vm14, %v2118_v53, 0.0  ;;  %v715_v56 = vsel %vm651_vm15, %v2119_v15, 0.0  ;;  %v2123_v7 = vld [vmem:[#allocation7_spill] sm:$0xff]  ;;  %v626_v41 = vpop.permute.xlu2 %625 }
  0xd4   : > { %776 = vadd.xlane.f32.xlu2 %v775_v4  ;;  %v792_v30 = vadd.f32 %v791_v27, %v723_v1  ;;  %v716_v63 = vsel %vm652_vm1, %v2120_v24, 0.0  ;;  %v717_v28 = vsel %vm653_vm2, %v2121_v44, 0.0  ;;  %v778_v14 = vadd.f32 %v711_v31, %v710_v0  ;;  %v2125_v1 = vld [vmem:[#allocation10_spill] sm:$0xff] }
  0xd5   : > { %v582_v18 = vadd.f32 %v1051_v43, %v581_v3  ;;  %v784_v12 = vsel %vm250_vm0, %v717_v28, 0.0  ;;  %v326_v25 = vsub.f32 %v2123_v7, %v2122_v59  ;;  %v327_v51 = vsub.f32 %v2124_v46, %v2122_v59 }
  0xd6   : > { %v793_v53 = vadd.f32 %v792_v30, %v724_v36  ;;  %v779_v4 = vadd.f32 %v778_v14, %v712_v23  ;;  %v328_v27 = vsub.f32 %v2125_v1, %v2122_v59  ;;  %v329_v15 = vsub.f32 %v2126_v58, %v2122_v59  ;;  %v2127_v36 = vld [vmem:[#allocation6_spill] sm:$0xff] }
  0xd7   : > { %v584_v24 = vadd.f32 %v583_v40, %v582_v18  ;;  %v330_v43 = vsub.f32 %v1279_v42, %v2122_v59  ;;  %v331_v0 = vsub.f32 %v1290_v47, %v2122_v59  ;;  %v332_v31 = vsub.f32 %v1293_v48, %v2122_v59 }
  0xd8   : > { %v795_v3 = vadd.f32 %v794_v29, %v793_v53  ;;  %v780_v44 = vadd.f32 %v779_v4, %v713_v37  ;;  %v2128_v23 = vsub.f32 %v2127_v36, %v2122_v59  ;;  %v391_v28 = vmul.f32 1.442695, %v326_v25  ;;  %v623_v37 = vpop.permute.xlu1 %622 }
  0xd9   : > { %585 = vadd.xlane.f32.xlu0 %v584_v24  ;;  %v393_v14 = vmul.f32 1.442695, %v327_v51  ;;  %v395_v7 = vmul.f32 1.442695, %v328_v27  ;;  %v397_v40 = vmul.f32 1.442695, %v329_v15  ;;  %vm678_vm3 = vcmp.eq.s32.totalorder %v1441_v38, %v626_v41 }
  0xda   : > { %v389_v30 = vmul.f32 1.442695, %v2128_v23  ;;  %796 = vadd.xlane.f32.xlu1 %v795_v3  ;;  %v781_v42 = vadd.f32 %v780_v44, %v714_v5  ;;  %v399_v47 = vmul.f32 1.442695, %v330_v43  ;;  %v401_v18 = vmul.f32 1.442695, %v331_v0 }
  0xdb   : > { %v403_v48 = vmul.f32 1.442695, %v332_v31  ;;  %vm679_vm4 = vcmp.eq.s32.totalorder %v1446_v55, %v626_v41  ;;  %vm680_vm5 = vcmp.eq.s32.totalorder %v1451_v26, %v626_v41  ;;  %vm681_vm6 = vcmp.eq.s32.totalorder %v2094_v62, %v626_v41  ;;  %v1119_v0 = vld [vmem:[%s1178_s15 + $0x148] sm:$0xff]  ;;  %v1120_v3 = vld [vmem:[%s1178_s15 + $0x150] sm:$0xff] }
  0xdc   : > { %1054 = vpow2.f32 %v389_v30  ;;  %v782_v29 = vadd.f32 %v781_v42, %v715_v56  ;;  %vm682_vm7 = vcmp.eq.s32.totalorder %v2095_v2, %v626_v41  ;;  %vm683_vm8 = vcmp.eq.s32.totalorder %v2096_v16, %v626_v41 }
  0xdd   : > { %1056 = vpow2.f32 %v391_v28  ;;  %vm684_vm10 = vcmp.eq.s32.totalorder %v1485_v45, %v626_v41  ;;  %vm685_vm9 = vcmp.eq.s32.totalorder %v2097_v57, %v626_v41  ;;  %v742_v25 = vsel %vm678_vm3, %v1362_v54, 0.0  ;;  %v1118_v41 = vld [vmem:[%s1178_s15 + $0x140] sm:$0xff] }
  0xde   : > { %1058 = vpow2.f32 %v393_v14  ;;  %v783_v5 = vadd.f32 %v782_v29, %v716_v63  ;;  %v743_v56 = vsel %vm679_vm4, %v1370_v10, 0.0  ;;  %v744_v46 = vsel %vm680_vm5, %v1373_v19, 0.0 }
  0xdf   : > { %1060 = vpow2.f32 %v395_v7  ;;  %v745_v51 = vsel %vm681_vm6, %v2089_v20, 0.0  ;;  %v746_v53 = vsel %vm682_vm7, %v2090_v9, 0.0  ;;  %v747_v27 = vsel %vm683_vm8, %v2091_v13, 0.0 }
  0xe0   : > { %1062 = vpow2.f32 %v397_v40  ;;  %v785_v1 = vadd.f32 %v784_v12, %v783_v5  ;;  %v748_v63 = vsel %vm684_vm10, %v2092_v8, 0.0  ;;  %v749_v54 = vsel %vm685_vm9, %v2093_v22, 0.0 }
  0xe1   : > { %1064 = vpow2.f32 %v399_v47  ;;  %v818_v10 = vadd.f32 %v743_v56, %v742_v25  ;;  %vm670_vm11 = vcmp.eq.s32.totalorder %v1441_v38, %v623_v37  ;;  %v824_v9 = vsel %vm250_vm0, %v749_v54, 0.0  ;;  %v1122_v25 = vld [vmem:[%s1178_s15 + $0xc8] sm:$0xff] }
  0xe2   : > { %v1055_v4 = vpop.eup %1054  ;;  %1066 = vpow2.f32 %v401_v18  ;;  %786 = vadd.xlane.f32.xlu0 %v785_v1  ;;  %vm671_vm12 = vcmp.eq.s32.totalorder %v1446_v55, %v623_v37  ;;  %vm672_vm13 = vcmp.eq.s32.totalorder %v1451_v26, %v623_v37  ;;  %vm673_vm14 = vcmp.eq.s32.totalorder %v2094_v62, %v623_v37  ;;  %v1121_v18 = vld [vmem:[%s1178_s15 + $0xc0] sm:$0xff] }
  0xe3   : > { %v1057_v58 = vpop.eup %1056  ;;  %1068 = vpow2.f32 %v403_v48  ;;  %v819_v8 = vadd.f32 %v818_v10, %v744_v46  ;;  %vm674_vm15 = vcmp.eq.s32.totalorder %v2095_v2, %v623_v37  ;;  %vm675_vm1 = vcmp.eq.s32.totalorder %v2096_v16, %v623_v37  ;;  %v1123_v46 = vld [vmem:[%s1178_s15 + $0xd0] sm:$0xff] }
  0xe4   : > { %v1059_v19 = vpop.eup %1058  ;;  %v517_v20 = vadd.f32 %v1057_v58, %v1055_v4  ;;  %vm676_vm2 = vcmp.eq.s32.totalorder %v1485_v45, %v623_v37  ;;  %vm677_vm3 = vcmp.eq.s32.totalorder %v2097_v57, %v623_v37  ;;  %v734_v15 = vsel %vm670_vm11, %v1118_v41, 0.0  ;;  %v1858_v41 = vld [vmem:[%s1178_s15 + $0x1c0] sm:$0xff] }
  0xe5   : > { %v1061_v13 = vpop.eup %1060  ;;  %v820_v43 = vadd.f32 %v819_v8, %v745_v51  ;;  %v735_v31 = vsel %vm671_vm12, %v1119_v0, 0.0  ;;  %v736_v44 = vsel %vm672_vm13, %v1120_v3, 0.0  ;;  %v737_v36 = vsel %vm673_vm14, %v1272_v39, 0.0 }
  0xe6   : > { %v1063_v22 = vpop.eup %1062  ;;  %v518_v12 = vadd.f32 %v1059_v19, %v517_v20  ;;  %v738_v28 = vsel %vm674_vm15, %v1297_v50, 0.0  ;;  %v739_v14 = vsel %vm675_vm1, %v1316_v60, 0.0  ;;  %v740_v7 = vsel %vm676_vm2, %v1319_v61, 0.0 }
  0xe7   : > { %v1065_v24 = vpop.eup %1064  ;;  %v821_v42 = vadd.f32 %v820_v43, %v746_v53  ;;  %v741_v47 = vsel %vm677_vm3, %v1328_v6, 0.0  ;;  %v808_v39 = vadd.f32 %v735_v31, %v734_v15  ;;  %v349_v48 = vsub.f32 %v1121_v18, %v1615_v52  ;;  %v1868_v43 = vld [vmem:[%s1178_s15 + $0x1d0] sm:$0xff]  ;;  %v2129_v31 = vld [vmem:[#allocation27_spill] sm:$0xff] }
  0xe8   : > { %v1067_v23 = vpop.eup %1066  ;;  %v519_v30 = vadd.f32 %v1061_v13, %v518_v12  ;;  %v814_v5 = vsel %vm250_vm0, %v741_v47, 0.0  ;;  %v350_v60 = vsub.f32 %v1122_v25, %v1615_v52  ;;  %v351_v51 = vsub.f32 %v1123_v46, %v1615_v52 }
  0xe9   : > { %v1069_v40 = vpop.eup %1068  ;;  %v822_v56 = vadd.f32 %v821_v42, %v747_v27  ;;  %v809_v61 = vadd.f32 %v808_v39, %v736_v44  ;;  %v352_v6 = vsub.f32 %v2109_v33, %v1615_v52  ;;  %v353_v53 = vsub.f32 %v2110_v34, %v1615_v52  ;;  %v2131_v39 = vld [vmem:[#allocation34_spill] sm:$0xff] }
  0xea   : > { %v520_v29 = vadd.f32 %v1063_v22, %v519_v30  ;;  %v523_v50 = vsel %vm250_vm0, %v1069_v40, 0.0  ;;  %v354_v4 = vsub.f32 %v2111_v35, %v1615_v52  ;;  %v355_v1 = vsub.f32 %v2112_v49, %v1615_v52 }
  0xeb   : > { %v823_v58 = vadd.f32 %v822_v56, %v748_v63  ;;  %v810_v54 = vadd.f32 %v809_v61, %v737_v36  ;;  %v356_v27 = vsub.f32 %v2113_v11, %v1615_v52  ;;  %v437_v10 = vmul.f32 1.442695, %v349_v48  ;;  %v2130_v36 = vld [vmem:[#allocation30_spill] sm:$0xff]  ;;  %v2132_v48 = vld [vmem:[#allocation37_spill] sm:$0xff] }
  0xec   : > { %v521_v37 = vadd.f32 %v1065_v24, %v520_v29  ;;  %v439_v20 = vmul.f32 1.442695, %v350_v60  ;;  %v441_v33 = vmul.f32 1.442695, %v351_v51  ;;  %v443_v13 = vmul.f32 1.442695, %v352_v6 }
  0xed   : > { %v825_v8 = vadd.f32 %v824_v9, %v823_v58  ;;  %v811_v34 = vadd.f32 %v810_v54, %v738_v28  ;;  %1070 = vpow2.f32 %v437_v10  ;;  %v445_v35 = vmul.f32 1.442695, %v353_v53  ;;  %v1863_v9 = vld [vmem:[%s1178_s15 + $0x1c8] sm:$0xff]  ;;  %v2133_v60 = vld [vmem:[#allocation36_spill] sm:$0xff]  ;;  %v1127_v58 = vld [vmem:[%s1178_s15 + $0x100] sm:$0xff] }
  0xee   : > { %v522_v19 = vadd.f32 %v1067_v23, %v521_v37  ;;  %1072 = vpow2.f32 %v439_v20  ;;  %v447_v49 = vmul.f32 1.442695, %v354_v4  ;;  %v449_v63 = vmul.f32 1.442695, %v355_v1 }
  0xef   : > { %826 = vadd.xlane.f32.xlu1 %v825_v8  ;;  %v812_v12 = vadd.f32 %v811_v34, %v739_v14  ;;  %1074 = vpow2.f32 %v441_v33  ;;  %v451_v11 = vmul.f32 1.442695, %v356_v27  ;;  %v381_v15 = vsub.f32 %v1858_v41, %v1666_v21  ;;  %v1128_v27 = vld [vmem:[%s1178_s15 + $0x108] sm:$0xff]  ;;  %v1129_v34 = vld [vmem:[%s1178_s15 + $0x110] sm:$0xff] }
  0xf0   : > { %v524_v22 = vadd.f32 %v523_v50, %v522_v19  ;;  %1076 = vpow2.f32 %v443_v13  ;;  %v382_v24 = vsub.f32 %v1863_v9, %v1666_v21  ;;  %v383_v0 = vsub.f32 %v1868_v43, %v1666_v21  ;;  %v1892_v13 = vpop.permute.xlu1 %628 }
  0xf1   : > { %v384_v3 = vsub.f32 %v2129_v31, %v1666_v21  ;;  %v813_v44 = vadd.f32 %v812_v12, %v740_v7  ;;  %1078 = vpow2.f32 %v445_v35  ;;  %v385_v23 = vsub.f32 %v2130_v36, %v1666_v21 }
  0xf2   : > { %525 = vadd.xlane.f32.xlu2 %v524_v22  ;;  %1080 = vpow2.f32 %v447_v49  ;;  %v501_v30 = vmul.f32 1.442695, %v381_v15  ;;  %v503_v40 = vmul.f32 1.442695, %v382_v24  ;;  %v505_v42 = vmul.f32 1.442695, %v383_v0 }
  0xf3   : > { %v1071_v28 = vpop.eup %1070  ;;  %v815_v14 = vadd.f32 %v814_v5, %v813_v44  ;;  %1082 = vpow2.f32 %v449_v63  ;;  %v386_v18 = vsub.f32 %v2131_v39, %v1666_v21  ;;  %v388_v29 = vsub.f32 %v2132_v48, %v1666_v21  ;;  %v1130_v49 = vld [vmem:[%s1178_s15 + $0x118] sm:$0xff] }
  0xf4   : > { %v1073_v47 = vpop.eup %1072  ;;  %1084 = vpow2.f32 %v451_v11  ;;  %v507_v7 = vmul.f32 1.442695, %v384_v3  ;;  %v387_v56 = vsub.f32 %v2133_v60, %v1666_v21  ;;  %v509_v61 = vmul.f32 1.442695, %v385_v23  ;;  %v1133_v60 = vld [vmem:[%s1178_s15 + $0x1d8] sm:$0xff] }
  0xf5   : > { %v1075_v50 = vpop.eup %1074  ;;  %816 = vadd.xlane.f32.xlu0 %v815_v14  ;;  %v547_v25 = vadd.f32 %v1073_v47, %v1071_v28  ;;  %1086 = vpow2.f32 %v501_v30  ;;  %vm662_vm4 = vcmp.eq.s32.totalorder %v1441_v38, %v1732_v17  ;;  %vm663_vm5 = vcmp.eq.s32.totalorder %v1446_v55, %v1732_v17 }
  0xf6   : > { %v1077_v5 = vpop.eup %1076  ;;  %1088 = vpow2.f32 %v503_v40  ;;  %v511_v37 = vmul.f32 1.442695, %v386_v18  ;;  %v515_v53 = vmul.f32 1.442695, %v388_v29  ;;  %vm664_vm6 = vcmp.eq.s32.totalorder %v1451_v26, %v1732_v17 }
  0xf7   : > { %v1079_v46 = vpop.eup %1078  ;;  %v548_v51 = vadd.f32 %v1075_v50, %v547_v25  ;;  %1090 = vpow2.f32 %v505_v42  ;;  %vm665_vm7 = vcmp.eq.s32.totalorder %v2094_v62, %v1732_v17  ;;  %v726_v54 = vsel %vm662_vm4, %v1127_v58, 0.0  ;;  %v1132_v50 = vld [vmem:[%s1178_s15 + $0x128] sm:$0xff] }
  0xf8   : > { %v1081_v6 = vpop.eup %1080  ;;  %1092 = vpow2.f32 %v507_v7  ;;  %v727_v10 = vsel %vm663_vm5, %v1128_v27, 0.0  ;;  %v513_v20 = vmul.f32 1.442695, %v387_v56  ;;  %v728_v35 = vsel %vm664_vm6, %v1129_v34, 0.0  ;;  %v1137_v27 = vld [vmem:[%s1178_s15 + $0x1e8] sm:$0xff] }
  0xf9   : > { %v1083_v4 = vpop.eup %1082  ;;  %v549_v1 = vadd.f32 %v1077_v5, %v548_v51  ;;  %1094 = vpow2.f32 %v509_v61  ;;  %v729_v63 = vsel %vm665_vm7, %v1130_v49, 0.0  ;;  %v798_v12 = vadd.f32 %v727_v10, %v726_v54  ;;  %v1134_v51 = vld [vmem:[%s1178_s15 + $0x130] sm:$0xff] }
  0xfa   : > { %v1085_v19 = vpop.eup %1084  ;;  %1096 = vpow2.f32 %v511_v37  ;;  %vm686_vm8 = vcmp.eq.s32.totalorder %v1441_v38, %v1892_v13  ;;  %vm687_vm10 = vcmp.eq.s32.totalorder %v1446_v55, %v1892_v13  ;;  %vm666_vm9 = vcmp.eq.s32.totalorder %v2095_v2, %v1732_v17  ;;  %v1131_v55 = vld [vmem:[%s1178_s15 + $0x120] sm:$0xff]  ;;  %v1135_v37 = vld [vmem:[%s1178_s15 + $0x138] sm:$0xff] }
  0xfb   : > { %v1087_v33 = vpop.eup %1086  ;;  %v550_v8 = vadd.f32 %v1079_v46, %v549_v1  ;;  %v553_v24 = vsel %vm250_vm0, %v1085_v19, 0.0  ;;  %1098 = vpow2.f32 %v515_v53  ;;  %v799_v3 = vadd.f32 %v798_v12, %v728_v35 }
  0xfc   : > { %v1089_v22 = vpop.eup %1088  ;;  %1100 = vpow2.f32 %v513_v20  ;;  %vm688_vm11 = vcmp.eq.s32.totalorder %v1451_v26, %v1892_v13  ;;  %v750_v40 = vsel %vm686_vm8, %v1858_v41, 0.0  ;;  %v751_v38 = vsel %vm687_vm10, %v1863_v9, 0.0  ;;  %v1138_v20 = vld [vmem:[%s1178_s15 + $0x1f0] sm:$0xff] }
  0xfd   : > { %v1091_v11 = vpop.eup %1090  ;;  %v551_v15 = vadd.f32 %v1081_v6, %v550_v8  ;;  %v587_v0 = vadd.f32 %v1089_v22, %v1087_v33  ;;  %v800_v30 = vadd.f32 %v799_v3, %v729_v63  ;;  %v730_v47 = vsel %vm666_vm9, %v1131_v55, 0.0  ;;  %v1139_v8 = vld [vmem:[%s1178_s15 + $0x1f8] sm:$0xff] }
  0xfe   : > { %v1093_v31 = vpop.eup %1092  ;;  %vm667_vm12 = vcmp.eq.s32.totalorder %v2096_v16, %v1732_v17  ;;  %vm689_vm13 = vcmp.eq.s32.totalorder %v2094_v62, %v1892_v13  ;;  %v752_v26 = vsel %vm688_vm11, %v1868_v43, 0.0  ;;  %v828_v41 = vadd.f32 %v751_v38, %v750_v40 }
  0xff   : > { %v552_v44 = vadd.f32 %v1083_v4, %v551_v15  ;;  %v588_v36 = vadd.f32 %v1091_v11, %v587_v0  ;;  %v1095_v23 = vpop.eup %1094  ;;  %v801_v9 = vadd.f32 %v800_v30, %v730_v47  ;;  %v731_v25 = vsel %vm667_vm12, %v1132_v50, 0.0  ;;  %v1136_v4 = vld [vmem:[%s1178_s15 + $0x1e0] sm:$0xff] }
 0x100   : > { %v1097_v42 = vpop.eup %1096  ;;  %v753_v56 = vsel %vm689_vm13, %v1133_v60, 0.0  ;;  %v829_v5 = vadd.f32 %v828_v41, %v752_v26  ;;  %vm668_vm14 = vcmp.eq.s32.totalorder %v1485_v45, %v1732_v17  ;;  %vm669_vm15 = vcmp.eq.s32.totalorder %v2097_v57, %v1732_v17  ;;  %v2136_v41 = vld [vmem:[#allocation48_spill] sm:$0xff] }
 0x101   : > { %v554_v28 = vadd.f32 %v553_v24, %v552_v44  ;;  %v589_v14 = vadd.f32 %v1093_v31, %v588_v36  ;;  %v1099_v39 = vpop.eup %1098  ;;  %v802_v43 = vadd.f32 %v801_v9, %v731_v25  ;;  %vm690_vm1 = vcmp.eq.s32.totalorder %v2095_v2, %v1892_v13  ;;  %v2134_v24 = vld [vmem:[#allocation49_spill] sm:$0xff] }
 0x102   : > { %v1101_v48 = vpop.eup %1100  ;;  %v593_v7 = vsel %vm250_vm0, %v1099_v39, 0.0  ;;  %v830_v46 = vadd.f32 %v829_v5, %v753_v56  ;;  %v732_v6 = vsel %vm668_vm14, %v1134_v51, 0.0  ;;  %v733_v53 = vsel %vm669_vm15, %v1135_v37, 0.0 }
 0x103   : > { %555 = vadd.xlane.f32.xlu2 %v554_v28  ;;  %v590_v18 = vadd.f32 %v1095_v23, %v589_v14  ;;  %v754_v1 = vsel %vm690_vm1, %v1136_v4, 0.0  ;;  %v803_v58 = vadd.f32 %v802_v43, %v732_v6  ;;  %vm691_vm2 = vcmp.eq.s32.totalorder %v2096_v16, %v1892_v13  ;;  %v2135_v23 = vld [vmem:[#allocation42_spill] sm:$0xff] }
 0x104   : > { %v831_v17 = vadd.f32 %v830_v46, %v754_v1  ;;  %v804_v54 = vsel %vm250_vm0, %v733_v53, 0.0  ;;  %v755_v10 = vsel %vm691_vm2, %v1137_v27, 0.0  ;;  %vm692_vm3 = vcmp.eq.s32.totalorder %v1485_v45, %v1892_v13 }
 0x105   : > { %v591_v29 = vadd.f32 %v1097_v42, %v590_v18  ;;  %v805_v2 = vadd.f32 %v804_v54, %v803_v58  ;;  %vm693_vm4 = vcmp.eq.s32.totalorder %v2097_v57, %v1892_v13  ;;  %v756_v33 = vsel %vm692_vm3, %v1138_v20, 0.0 }
 0x106   : > { %v832_v19 = vadd.f32 %v831_v17, %v755_v10  ;;  %v757_v34 = vsel %vm693_vm4, %v1139_v8, 0.0 }
 0x107   : > { %v592_v61 = vadd.f32 %v1101_v48, %v591_v29  ;;  %v834_v35 = vsel %vm250_vm0, %v757_v34, 0.0  ;;  %vm870_vm0 = vcmask 7168  }
 0x108   : > { %v833_v16 = vadd.f32 %v832_v19, %v756_v33 }
 0x109   : > { %v594_v62 = vadd.f32 %v593_v7, %v592_v61 }
 0x10a   : > { %v835_v22 = vadd.f32 %v834_v35, %v833_v16 }
 0x10b   : > { %595 = vadd.xlane.f32.xlu2 %v594_v62 }
 0x113   : > { %806 = vadd.xlane.f32.xlu2 %v805_v2 }
 0x11b   : > { %836 = vadd.xlane.f32.xlu2 %v835_v22 }
 0x129   : > { %v767_v63 = vpop.xlane.xlu1 %766 }
 0x131   : > { %v546_v15 = vpop.xlane.xlu1 %545 }
 0x133   : > { %v536_v49 = vpop.xlane.xlu0 %535 }
 0x134   : > { %1102 = vlog2.f32 %v536_v49 }
 0x135   : > { %1104 = vlog2.f32 %v546_v15 }
 0x13a   : > { %v1103_v12 = vpop.eup %1102 }
 0x13b   : > { %v841_v45 = vmul.f32 0.6931472, %v1103_v12  ;;  %v1105_v3 = vpop.eup %1104 }
 0x13c   : > { %v566_v11 = vpop.xlane.xlu0 %565  ;;  %v843_v36 = vmul.f32 0.6931472, %v1105_v3 }
 0x13d   : > { %v855_v57 = vadd.f32 %v841_v45, %v2134_v24 }
 0x13e   : > { %v856_v30 = vadd.f32 %v843_v36, %v2135_v23 }
 0x144   : > { %v576_v44 = vpop.xlane.xlu1 %575 }
 0x147   : > { %v777_v13 = vpop.xlane.xlu2 %776 }
 0x148   : > { %v863_v0 = vsub.f32 %v855_v57, %v777_v13 }
 0x14a   : > { %872 = vst.msk [vmem:[%s1945_s22 + $0x8] sm:$0xff] %vm870_vm0, %v863_v0 }
 0x14c   : > { %v586_v31 = vpop.xlane.xlu0 %585 }
 0x14d   : > { %1106 = vlog2.f32 %v586_v31  ;;  %v797_v40 = vpop.xlane.xlu1 %796 }
 0x14e   : > { %1108 = vlog2.f32 %v576_v44 }
 0x153   : > { %v1107_v38 = vpop.eup %1106 }
 0x154   : > { %v851_v42 = vmul.f32 0.6931472, %v1107_v38  ;;  %v1109_v55 = vpop.eup %1108 }
 0x155   : > { %v787_v28 = vpop.xlane.xlu0 %786  ;;  %v849_v18 = vmul.f32 0.6931472, %v1109_v55 }
 0x156   : > { %v864_v14 = vsub.f32 %v856_v30, %v787_v28  ;;  %v860_v47 = vadd.f32 %v851_v42, %v1582_v32 }
 0x157   : > { %v859_v29 = vadd.f32 %v849_v18, %v2136_v41 }
 0x158   : > { %873 = vst.msk [vmem:[%s1945_s22 + $0x10] sm:$0xff] %vm870_vm0, %v864_v14 }
 0x162   : > { %v827_v39 = vpop.xlane.xlu1 %826 }
 0x163   : > { %v868_v48 = vsub.f32 %v860_v47, %v827_v39 }
 0x165   : > { %v526_v26 = vpop.xlane.xlu2 %525  ;;  %877 = vst.msk [vmem:[%s1945_s22 + $0x30] sm:$0xff] %vm870_vm0, %v868_v48 }
 0x166   : > { %1110 = vlog2.f32 %v526_v26 }
 0x168   : > { %v817_v9 = vpop.xlane.xlu0 %816 }
 0x169   : > { %v867_v7 = vsub.f32 %v859_v29, %v817_v9 }
 0x16b   : > { %876 = vst.msk [vmem:[%s1945_s22 + $0x28] sm:$0xff] %vm870_vm0, %v867_v7 }
 0x16c   : > { %v1111_v50 = vpop.eup %1110 }
 0x16d   : > { %v839_v25 = vmul.f32 0.6931472, %v1111_v50 }
 0x16f   : > { %v854_v60 = vadd.f32 %v839_v25, %v2122_v59  ;;  %v2137_v59 = vld [vmem:[#allocation41_spill] sm:$0xff] }
 0x171   : > { %v862_v56 = vsub.f32 %v854_v60, %v767_v63 }
 0x173   : > { %871 = vst.msk [vmem:[%s1945_s22] sm:$0xff] %vm870_vm0, %v862_v56 }
 0x176   : > { %v556_v32 = vpop.xlane.xlu2 %555 }
 0x177   : > { %1112 = vlog2.f32 %v556_v32 }
 0x178   : > { %1114 = vlog2.f32 %v566_v11 }
 0x17d   : > { %v1113_v5 = vpop.eup %1112 }
 0x17e   : > { %v1115_v61 = vpop.eup %1114  ;;  %v845_v62 = vmul.f32 0.6931472, %v1113_v5  ;;  %v596_v43 = vpop.xlane.xlu2 %595 }
 0x17f   : > { %1116 = vlog2.f32 %v596_v43  ;;  %v847_v51 = vmul.f32 0.6931472, %v1115_v61 }
 0x180   : > { %v857_v46 = vadd.f32 %v845_v62, %v1615_v52 }
 0x181   : > { %v858_v37 = vadd.f32 %v847_v51, %v2137_v59 }
 0x182   : > { %v865_v6 = vsub.f32 %v857_v46, %v797_v40 }
 0x184   : > { %874 = vst.msk [vmem:[%s1945_s22 + $0x18] sm:$0xff] %vm870_vm0, %v865_v6 }
 0x185   : > { %v1117_v53 = vpop.eup %1116 }
 0x186   : > { %v807_v4 = vpop.xlane.xlu2 %806  ;;  %v853_v58 = vmul.f32 0.6931472, %v1117_v53 }
 0x187   : > { %v866_v1 = vsub.f32 %v858_v37, %v807_v4 }
 0x188   : > { %v861_v17 = vadd.f32 %v853_v58, %v1666_v21 }
 0x189   : > { %875 = vst.msk [vmem:[%s1945_s22 + $0x20] sm:$0xff] %vm870_vm0, %v866_v1 }
 0x18e   : > { %v837_v54 = vpop.xlane.xlu2 %836 }
 0x18f   : > { %v869_v27 = vsub.f32 %v861_v17, %v837_v54 }
 0x191   : > { %878 = vst.msk [vmem:[%s1945_s22 + $0x38] sm:$0xff] %vm870_vm0, %v869_v27 }
 0x192 PF: > { %s12_s9 = sadd.s32 1, %s1146_s9  }
 0x193   : > { %p9_p4 = scmp.ge.s32.totalorder %s12_s9, 6  }
 0x195   :  { %11 = sbr.rel (!%p9_p4) target bundleno = 1 (0x1), region = 61 }

</bundles_post_ra>
